<compile_context>
chip_gen: v7x
topology: tpu7x:2x2x1
jax: 0.10.0
libtpu: 0.0.40
codegen_flags: <defaults>
</compile_context>

<pallas_src>
import jax
import jax.numpy as jnp
from jax.experimental import pallas as pl
from jax.experimental.pallas import tpu as pltpu


# Safe scoped-VMEM request for all generations (v7x physical VMEM is 64 MiB).
_VMEM_LIMIT_BYTES = 32 * 1024 * 1024
# ~1 MiB per input tile: double-buffered 2 inputs + 1 output stays ~6 MiB,
# well inside even v5e's 16 MiB default, and is already on the measured
# HBM-roofline plateau (>=512-wide tiles).  Raise on v5e/v6e if desired.
_TILE_TARGET_BYTES = 1 << 20


def _param_loss_kernel(out_ref, gt_ref, valid_ref, loss_ref):
    # Elementwise hot path: |out - gt| * valid, NaNs zeroed.
    # valid_ref block may be (T,1)/(1,D)/(1,1)/(T,D); broadcast happens here
    # in registers instead of in HBM.
    diff = jnp.abs(out_ref[...] - gt_ref[...]) * valid_ref[...]
    loss_ref[...] = jnp.where(jnp.isnan(diff), jnp.zeros_like(diff), diff)


def _tile_rows(n_rows, row_bytes, target_bytes=_TILE_TARGET_BYTES):
    """Rows per tile: multiple of 8 sublanes, ~target_bytes per tile."""
    t = max(1, target_bytes // max(int(row_bytes), 1))
    t = (t // 8) * 8
    if t < 8:
        t = 8
    if t >= n_rows:
        return n_rows  # single full block (block dim == full array dim is legal)
    return t


def _compiler_params():
    return pltpu.CompilerParams(
        dimension_semantics=("parallel",),
        vmem_limit_bytes=_VMEM_LIMIT_BYTES,
    )


def param_loss(param_out, param_gt, valid):
    """Pallas implementation of ParamLoss.forward.

    param_out, param_gt: (B, D) float arrays.
    valid: broadcastable to (B, D) -- scalar, (B,), (B,1), (1,D) or (B,D).
    returns: (B, D) loss, dtype of param_out.
    """
    param_out = jnp.asarray(param_out)
    param_gt = jnp.asarray(param_gt)
    dtype = param_out.dtype
    B, D = param_out.shape

    # Normalize `valid` to a 2-D broadcastable shape WITHOUT materializing the
    # full (B, D) broadcast.
    valid = jnp.asarray(valid, dtype)
    if valid.ndim == 0:
        valid = valid.reshape(1, 1)
    elif valid.ndim == 1:
        valid = valid.reshape(B, 1) if valid.shape[0] == B else valid.reshape(1, -1)
    assert valid.ndim == 2, "valid must broadcast to (B, D)"

    itemsize = jnp.dtype(dtype).itemsize

    # Lane-dense path: valid is full-shape and D is not already a multiple of
    # 128 -> flatten everything to (rows, width>=128).  Contiguous reshapes are
    # metadata-only (no extra HBM traffic).
    if valid.shape == (B, D) and D % 128 != 0 and (B * D) % 128 == 0:
        total = B * D
        width = next(w for w in (2048, 1024, 512, 256, 128) if total % w == 0)
        rows = total // width
        tr = _tile_rows(rows, width * itemsize)
        spec = pl.BlockSpec((tr, width), lambda i: (i, 0))
        out = pl.pallas_call(
            _param_loss_kernel,
            out_shape=jax.ShapeDtypeStruct((rows, width), dtype),
            grid=(pl.cdiv(rows, tr),),
            in_specs=[spec, spec, spec],
            out_specs=spec,
            compiler_params=_compiler_params(),
        )(
            param_out.reshape(rows, width),
            param_gt.reshape(rows, width),
            valid.reshape(rows, width),
        )
        return out.reshape(B, D)

    # General path: row-tiled (TILE_B, D) blocks for the params, `valid` kept
    # in its broadcast shape with its own (tiny) BlockSpec.
    tr = _tile_rows(B, D * itemsize)
    p_spec = pl.BlockSpec((tr, D), lambda i: (i, 0))

    v_rows = tr if valid.shape[0] == B else 1
    v_cols = D if valid.shape[1] == D else 1
    if valid.shape[0] == B:
        v_index = lambda i: (i, 0)
    else:
        v_index = lambda i: (0, 0)
    v_spec = pl.BlockSpec((v_rows, v_cols), v_index)

    return pl.pallas_call(
        _param_loss_kernel,
        out_shape=jax.ShapeDtypeStruct((B, D), dtype),
        grid=(pl.cdiv(B, tr),),
        in_specs=[p_spec, p_spec, v_spec],
        out_specs=p_spec,
        compiler_params=_compiler_params(),
    )(param_out, param_gt, valid)


def _param_loss_ref(param_out, param_gt, valid):
    valid = jnp.broadcast_to(jnp.asarray(valid, param_out.dtype), param_out.shape)
    loss = jnp.abs(param_out - param_gt) * valid
    return jnp.where(jnp.isnan(loss), 0.0, loss)


if __name__ == "__main__":
    key = jax.random.PRNGKey(0)
    k1, k2, k3, k4 = jax.random.split(key, 4)

    # Case 1: per-row valid mask (B, 1); exercises the un-broadcast valid path.
    B, D = 8, 32
    param_out = jax.random.normal(k1, (B, D), dtype=jnp.float32)
    param_gt = jax.random.normal(k2, (B, D), dtype=jnp.float32)
    # Inject NaNs in the ground truth to exercise the NaN-zeroing path.
    param_gt = param_gt.at[0, 0].set(jnp.nan)
    param_gt = param_gt.at[3, 5].set(jnp.nan)
    valid = (jax.random.uniform(k3, (B, 1)) > 0.3).astype(jnp.float32)

    loss1 = jax.block_until_ready(param_loss(param_out, param_gt, valid))
    ref1 = _param_loss_ref(param_out, param_gt, valid)
    assert loss1.shape == (B, D)
    assert not bool(jnp.any(jnp.isnan(loss1)))
    assert bool(jnp.allclose(loss1, ref1, atol=1e-6))

    # Case 2: full-shape valid (B, D); exercises the lane-dense flattened path.
    B2, D2 = 16, 32
    po2 = jax.random.normal(k4, (B2, D2), dtype=jnp.float32)
    pg2 = jnp.roll(po2, 1, axis=0)
    pg2 = pg2.at[2, 7].set(jnp.nan)
    valid2 = (jax.random.uniform(k3, (B2, D2)) > 0.5).astype(jnp.float32)

    loss2 = jax.block_until_ready(param_loss(po2, pg2, valid2))
    ref2 = _param_loss_ref(po2, pg2, valid2)
    assert loss2.shape == (B2, D2)
    assert not bool(jnp.any(jnp.isnan(loss2)))
    assert bool(jnp.allclose(loss2, ref2, atol=1e-6))

    print("KERNEL_OK")
</pallas_src>

<mosaic_0001>
module attributes {stable_mosaic.version = 11 : i64} {
  func.func @_param_loss_kernel(%arg0: i32, %arg1: memref<8x32xf32, #tpu.memory_space<vmem>>, %arg2: memref<8x32xf32, #tpu.memory_space<vmem>>, %arg3: memref<8x1xf32, #tpu.memory_space<vmem>>, %arg4: memref<8x32xf32, #tpu.memory_space<vmem>>) attributes {dimension_semantics = [#tpu.dimension_semantics<parallel>], iteration_bounds = array<i64: 1>, scalar_prefetch = 0 : i64, scratch_operands = 0 : i64, tpu.core_type = #tpu.core_type<tc>, window_params = [{transform_indices = @transform_0, window_bounds = array<i64: 8, 32>}, {transform_indices = @transform_1, window_bounds = array<i64: 8, 32>}, {transform_indices = @transform_2, window_bounds = array<i64: 8, 1>}, {transform_indices = @transform_3, window_bounds = array<i64: 8, 32>}]} {
    %c0 = arith.constant 0 : index
    %c0_0 = arith.constant 0 : index
    %0 = vector.load %arg1[%c0, %c0_0] : memref<8x32xf32, #tpu.memory_space<vmem>>, vector<8x32xf32>
    %c0_1 = arith.constant 0 : index
    %c0_2 = arith.constant 0 : index
    %1 = vector.load %arg2[%c0_1, %c0_2] : memref<8x32xf32, #tpu.memory_space<vmem>>, vector<8x32xf32>
    %2 = arith.subf %0, %1 : vector<8x32xf32>
    %3 = math.absf %2 : vector<8x32xf32>
    %c0_3 = arith.constant 0 : index
    %c0_4 = arith.constant 0 : index
    %4 = vector.load %arg3[%c0_3, %c0_4] : memref<8x1xf32, #tpu.memory_space<vmem>>, vector<8x1xf32>
    %5 = vector.broadcast %4 : vector<8x1xf32> to vector<8x32xf32>
    %6 = arith.mulf %3, %5 : vector<8x32xf32>
    %7 = arith.cmpf one, %6, %6 : vector<8x32xf32>
    %cst = arith.constant 0.000000e+00 : f32
    %8 = vector.broadcast %cst : f32 to vector<8x32xf32>
    %9 = arith.select %7, %8, %6 : vector<8x32xi1>, vector<8x32xf32>
    %c0_5 = arith.constant 0 : index
    %c0_6 = arith.constant 0 : index
    %10 = vector.load %arg4[%c0_5, %c0_6] : memref<8x32xf32, #tpu.memory_space<vmem>>, vector<8x32xf32>
    tpu.vector_store %arg4[%c0_5, %c0_6], %9 {strides = array<i32>} : memref<8x32xf32, #tpu.memory_space<vmem>>, vector<8x32xf32>,
    return
  }
  func.func @transform_0(%arg0: i32) -> (i32, i32) {
    %c0_i32 = arith.constant 0 : i32
    %c0_i32_0 = arith.constant 0 : i32
    return %arg0, %c0_i32 : i32, i32
  }
  func.func @transform_1(%arg0: i32) -> (i32, i32) {
    %c0_i32 = arith.constant 0 : i32
    %c0_i32_0 = arith.constant 0 : i32
    return %arg0, %c0_i32 : i32, i32
  }
  func.func @transform_2(%arg0: i32) -> (i32, i32) {
    %c0_i32 = arith.constant 0 : i32
    %c0_i32_0 = arith.constant 0 : i32
    return %arg0, %c0_i32 : i32, i32
  }
  func.func @transform_3(%arg0: i32) -> (i32, i32) {
    %c0_i32 = arith.constant 0 : i32
    %c0_i32_0 = arith.constant 0 : i32
    return %arg0, %c0_i32 : i32, i32
  }
}

</mosaic_0001>

<bundles_post_ra>
// kernel: tpu_custom_call.1
= control target key start
LH: loop header
LB: loop body
LE: loop exit
PB: predicated region body
PF: predicated region fallthrough
CT: control target
= control target key end

     0   :  { %8 = vsyncpa [#allocation3], 0  ;;  %s162_s0 = inlined_call_operand.vmem [shape: f32[8,32], index: 0, kind: input, shape index: {}]   ;;  %s163_s1 = inlined_call_operand.hbm [shape: f32[8,32], index: 1, kind: input, shape index: {}]   ;;  %s164_s2 = inlined_call_operand.vmem [shape: f32[8,1], index: 2, kind: input, shape index: {}]   ;;  %s165_s3 = inlined_call_operand.hbm [shape: f32[8,32], index: 3, kind: output, shape index: {}]  }
   0x1   :  { %9 = vsyncpa [#allocation4], 0  ;;  %s109_s12 = smov [#allocation2]   ;;  %s61_s16 = scalar_lea.hbm %s163_s1, 128 }
   0x2   :  { %s18_s13 = sshll.u32 %s109_s12, 4  ;;  %p62_p0 = scmp.ne.s32.totalorder %s163_s1, %s61_s16  ;;  %s19_s13 = int_to_ptr.vmem [resolvable:$true] %s18_s13 }
   0x3   :  { %p65_p1 = scmp.lt.u32.totalorder %s61_s16, %s163_s1 }
   0x5   :  { %p67_p2 = pnand %p65_p1, %p62_p0 }
   0x7   :  { %70 = shalt.err (!%p67_p2)
}
   0x8   :  { %s71_s21 = scalar_lea.vmem %s19_s13, 128  ;;  %p76_p4 = scmp.lt.s32.totalorder %s19_s13, %s19_s13 }
   0x9   :  { %p72_p3 = scmp.ne.s32.totalorder %s19_s13, %s71_s21  ;;  %p77_p5 = scmp.lt.s32.totalorder %s71_s21, %s71_s21 }
   0xb   :  { %p78_p6 = por %p77_p5, %p76_p4 }
   0xd   :  { %p79_p7 = pnand %p78_p6, %p72_p3 }
   0xf   :  { %82 = shalt.err (!%p79_p7)
}
  0x10   :  { %21 = dma.hbm_to_vmem [thread:$0]  %s163_s1, 128, %s19_s13, [#allocation3]  }
  0x11   :  { %105 = dma.done.wait [#allocation3], 128  }
  0x12   :  { %106 = vsyncadd [#allocation3], 4294967168  ;;  %v110_v0 = vmov 0   ;;  %v31_v1 = vld [vmem:[%s164_s2] sm:$0xff]  ;;  %s111_s28 = smov [#allocation5]   ;;  %vm40_vm0 = vcmask 261120  }
  0x13   :  { %60 = vset.pattern.permute.xlu0 %v110_v0  ;;  %v27_v2 = vld [vmem:[%s162_s0] sm:$0xff]  ;;  %s48_s29 = sshll.u32 %s111_s28, 4  ;;  %s49_s29 = int_to_ptr.vmem [resolvable:$true] %s48_s29 }
  0x14   :  { %34 = vperm.xlu0 %60, %v31_v1   ;;  %v28_v3 = vld [vmem:[#allocation2] sm:$0xff]  ;;  %s83_s1 = scalar_lea.vmem %s49_s29, 128  ;;  %p88_p9 = scmp.lt.s32.totalorder %s49_s29, %s49_s29 }
  0x15   :  { %v29_v4 = vsub.f32 %v27_v2, %v28_v3  ;;  %p84_p8 = scmp.ne.s32.totalorder %s49_s29, %s83_s1  ;;  %p89_p10 = scmp.lt.s32.totalorder %s83_s1, %s83_s1 }
  0x17   :  { %v30_v5 = vand.u32 2147483647, %v29_v4  ;;  %p90_p11 = por %p89_p10, %p88_p9 }
  0x19   :  { %p91_p12 = pnand %p90_p11, %p84_p8 }
  0x93   :  { %v35_v6 = vpop.permute.xlu0 %34 }
  0x94   :  { %v37_v7 = vmul.f32 %v35_v6, %v30_v5 }
  0x96   :  { %vm38_vm1 = vcmp.ne.f32.partialorder %v37_v7, %v37_v7 }
  0x97   :  { %v39_v8 = vsel %vm38_vm1, 0.0, %v37_v7 }
  0x98   :  { %41 = vst.msk [vmem:[#allocation5] sm:$0xff] %vm40_vm0, %v39_v8 }
  0x99   :  { %94 = shalt.err (!%p91_p12)
}
  0x9a   :  { %s95_s30 = scalar_lea.hbm %s165_s3, 128 }
  0x9b   :  { %p96_p13 = scmp.ne.s32.totalorder %s165_s3, %s95_s30  ;;  %p99_p0 = scmp.lt.u32.totalorder %s95_s30, %s165_s3 }
  0x9d   :  { %p101_p1 = pnand %p99_p0, %p96_p13 }
  0x9f   :  { %104 = shalt.err (!%p101_p1)
}
  0xa0   :  { %51 = dma.vmem_to_hbm [thread:$0]  %s49_s29, 128, %s165_s3, [#allocation4]  }
  0xa1   :  { %107 = dma.done.wait [#allocation4], 128  }
  0xa2   :  { %108 = vsyncadd [#allocation4], 4294967168 }
  0xa3   :  { %55 = vsyncpa [#allocation3], 1 }
  0xa4   :  { %56 = vsyncpa [#allocation4], 1 }

</bundles_post_ra>
